<compile_context>
chip_gen: v5e
topology: v5e:2x2
jax: 0.10.0
libtpu: 0.0.40
codegen_flags: <defaults>
</compile_context>

<pallas_src>
import jax
import jax.numpy as jnp
from jax import lax
from jax.experimental import pallas as pl
from jax.experimental.pallas import tpu as pltpu

LANE = 128
SUBLANE = 8
_UNROLL_T = 8                      # static time unroll up to this many steps
_GATE_ORDER = (0, 1, 3, 2)         # torch [i, f, g, o] -> packed [i, f, o, g]


def _round_up(n, m):
    return ((n + m - 1) // m) * m


# ----------------------------------------------------------------------------
# Kernel
# ----------------------------------------------------------------------------
def make_decoder_kernel(num_layers, seq_len, hidden_size):
    H = hidden_size

    def kernel(*refs):
        # inputs: x, h0, c0, then per layer (w_ih, w_hh, bias), fc_w, fc_b
        # outputs: pred_all, h_out, c_out
        x_ref, h0_ref, c0_ref = refs[0], refs[1], refs[2]
        idx = 3
        w_ih_refs, w_hh_refs, b_refs = [], [], []
        for _ in range(num_layers):
            w_ih_refs.append(refs[idx])
            w_hh_refs.append(refs[idx + 1])
            b_refs.append(refs[idx + 2])
            idx += 3
        fcw_ref, fcb_ref = refs[idx], refs[idx + 1]
        pred_ref, hout_ref, cout_ref = refs[idx + 2], refs[idx + 3], refs[idx + 4]

        # Hoist weight / bias loads out of the time loop.  Weights are compact
        # bf16 (a few vregs each), so this adds no spill pressure and no large
        # VMEM->VMEM copies.  Bias stays (1, 4H); the add broadcasts it.
        w_ih = [w_ih_refs[l][...] for l in range(num_layers)]
        w_hh = [w_hh_refs[l][...] for l in range(num_layers)]
        bias = [b_refs[l][...] for l in range(num_layers)]      # (1, 4H) f32
        fc_w = fcw_ref[...]                                      # (H, Op) bf16
        fc_b = fcb_ref[...]                                      # (1, Op) f32

        def step(t, h_list, c_list):
            """One timestep through all layers; states f32, matmul operands bf16."""
            inp = x_ref[t]                                       # (Bt, in_dim) f32
            new_h, new_c = [], []
            for l in range(num_layers):
                z = (jnp.dot(inp.astype(jnp.bfloat16), w_ih[l],
                             preferred_element_type=jnp.float32)
                     + jnp.dot(h_list[l].astype(jnp.bfloat16), w_hh[l],
                               preferred_element_type=jnp.float32)
                     + bias[l])                                  # (Bt, 4H), [i,f,o,g]
                sig = jax.nn.sigmoid(z[:, :3 * H])               # one contiguous EUP slab
                i_g = sig[:, 0 * H:1 * H]
                f_g = sig[:, 1 * H:2 * H]
                o_g = sig[:, 2 * H:3 * H]
                g_g = jnp.tanh(z[:, 3 * H:4 * H])
                c_new = f_g * c_list[l] + i_g * g_g
                h_new = o_g * jnp.tanh(c_new)
                new_h.append(h_new)
                new_c.append(c_new)
                inp = h_new
            pred = jnp.dot(inp.astype(jnp.bfloat16), fc_w,
                           preferred_element_type=jnp.float32) + fc_b
            pred_ref[t] = pred.astype(pred_ref.dtype)            # lane-dense (Bt, Op) store
            return new_h, new_c

        h_list = [h0_ref[l] for l in range(num_layers)]
        c_list = [c0_ref[l] for l in range(num_layers)]

        if seq_len <= _UNROLL_T:
            for t in range(seq_len):                             # small T: static unroll
                h_list, c_list = step(t, h_list, c_list)
        else:
            def body(t, carry):                                  # chunked decode: visible loop
                hs, cs = carry
                hs, cs = step(t, list(hs), list(cs))
                return (tuple(hs), tuple(cs))
            hs, cs = lax.fori_loop(0, seq_len, body,
                                   (tuple(h_list), tuple(c_list)), unroll=2)
            h_list, c_list = list(hs), list(cs)

        for l in range(num_layers):
            hout_ref[l] = h_list[l].astype(hout_ref.dtype)
            cout_ref[l] = c_list[l].astype(cout_ref.dtype)

    return kernel


# ----------------------------------------------------------------------------
# Parameter packing (compact, bf16, gate order [i, f, o, g])
# ----------------------------------------------------------------------------
def _reorder_gate_blocks(w, H):
    """Reorder the leading 4H axis from torch [i,f,g,o] to packed [i,f,o,g]."""
    return jnp.concatenate([w[k * H:(k + 1) * H] for k in _GATE_ORDER], axis=0)


def pack_params(params, hidden_size, output_size, num_layers,
                weight_dtype=jnp.bfloat16):
    H, O = hidden_size, output_size
    Op = _round_up(O, LANE)
    w_ih, w_hh, bias = [], [], []
    for l in range(num_layers):
        w_ih.append(_reorder_gate_blocks(params["w_ih"][l], H).T.astype(weight_dtype))
        w_hh.append(_reorder_gate_blocks(params["w_hh"][l], H).T.astype(weight_dtype))
        b = _reorder_gate_blocks(params["b_ih"][l] + params["b_hh"][l], H)
        bias.append(b.reshape(1, 4 * H).astype(jnp.float32))
    fc_w = jnp.pad(params["fc_w"].T, ((0, 0), (0, Op - O))).astype(weight_dtype)  # (H, Op)
    fc_b = jnp.pad(params["fc_b"].reshape(1, O), ((0, 0), (0, Op - O)))           # (1, Op)
    return {"w_ih": w_ih, "w_hh": w_hh, "b": bias,
            "fc_w": fc_w, "fc_b": fc_b, "Op": Op}


# ----------------------------------------------------------------------------
# Wrapper
# ----------------------------------------------------------------------------
def decoder_forward(x, h0, c0, params, input_size, hidden_size, output_size):
    """Pallas forward of Decoder.forward(x, hidden, cell) (eval mode)."""
    T, B, I = x.shape
    L = h0.shape[0]
    H, O = hidden_size, output_size

    packed = pack_params(params, H, O, L)
    Op = packed["Op"]

    Bp = _round_up(B, SUBLANE)
    Bt = SUBLANE                        # per-program batch tile (one sublane group)
    nb = Bp // Bt

    x_p = jnp.pad(x, ((0, 0), (0, Bp - B), (0, 0)))
    h0_p = jnp.pad(h0, ((0, 0), (0, Bp - B), (0, 0)))
    c0_p = jnp.pad(c0, ((0, 0), (0, Bp - B), (0, 0)))

    inputs = [x_p, h0_p, c0_p]
    in_specs = [
        pl.BlockSpec((T, Bt, I), lambda i: (0, i, 0)),
        pl.BlockSpec((L, Bt, H), lambda i: (0, i, 0)),
        pl.BlockSpec((L, Bt, H), lambda i: (0, i, 0)),
    ]
    for l in range(L):
        for w in (packed["w_ih"][l], packed["w_hh"][l], packed["b"][l]):
            inputs.append(w)
            in_specs.append(pl.BlockSpec(w.shape, lambda i: (0, 0)))
    for w in (packed["fc_w"], packed["fc_b"]):
        inputs.append(w)
        in_specs.append(pl.BlockSpec(w.shape, lambda i: (0, 0)))

    out_shapes = (
        jax.ShapeDtypeStruct((T, Bp, Op), jnp.float32),
        jax.ShapeDtypeStruct((L, Bp, H), jnp.float32),
        jax.ShapeDtypeStruct((L, Bp, H), jnp.float32),
    )
    out_specs = (
        pl.BlockSpec((T, Bt, Op), lambda i: (0, i, 0)),
        pl.BlockSpec((L, Bt, H), lambda i: (0, i, 0)),
        pl.BlockSpec((L, Bt, H), lambda i: (0, i, 0)),
    )

    kernel = make_decoder_kernel(L, T, H)
    pred_all, h_out, c_out = pl.pallas_call(
        kernel,
        out_shape=out_shapes,
        grid=(nb,),
        in_specs=in_specs,
        out_specs=out_specs,
        # Recurrent state buffers are reused across decode calls: h0 -> h_out,
        # c0 -> c_out.
        input_output_aliases={1: 1, 2: 2},
        compiler_params=pltpu.CompilerParams(
            dimension_semantics=("parallel",)),
    )(*inputs)

    # Strip batch / lane padding.
    pred_all = pred_all[:, :B, :O]
    h_out = h_out[:, :B, :]
    c_out = c_out[:, :B, :]

    # torch .squeeze(0): squeezes only when the leading (seq) dim is 1.
    predictions = pred_all[0] if T == 1 else pred_all
    return predictions, h_out, c_out


# ----------------------------------------------------------------------------
# Init + pure-JAX reference (PyTorch eval-mode semantics)
# ----------------------------------------------------------------------------
def init_decoder_params(key, input_size, hidden_size, output_size, num_layers):
    H = hidden_size
    k_lstm = 1.0 / jnp.sqrt(jnp.float32(H))
    w_ih, w_hh, b_ih, b_hh = [], [], [], []
    for l in range(num_layers):
        in_dim = input_size if l == 0 else hidden_size
        key, k1, k2, k3, k4 = jax.random.split(key, 5)
        w_ih.append(jax.random.uniform(k1, (4 * H, in_dim), jnp.float32, -k_lstm, k_lstm))
        w_hh.append(jax.random.uniform(k2, (4 * H, H), jnp.float32, -k_lstm, k_lstm))
        b_ih.append(jax.random.uniform(k3, (4 * H,), jnp.float32, -k_lstm, k_lstm))
        b_hh.append(jax.random.uniform(k4, (4 * H,), jnp.float32, -k_lstm, k_lstm))
    k_fc = 1.0 / jnp.sqrt(jnp.float32(H))
    key, k1, k2 = jax.random.split(key, 3)
    fc_w = jax.random.uniform(k1, (output_size, H), jnp.float32, -k_fc, k_fc)
    fc_b = jax.random.uniform(k2, (output_size,), jnp.float32, -k_fc, k_fc)
    return {"w_ih": w_ih, "w_hh": w_hh, "b_ih": b_ih, "b_hh": b_hh,
            "fc_w": fc_w, "fc_b": fc_b}


def decoder_reference(x, h0, c0, params):
    T, B, I = x.shape
    L, _, H = h0.shape
    h = [h0[l] for l in range(L)]
    c = [c0[l] for l in range(L)]
    preds = []
    for t in range(T):
        inp = x[t]
        for l in range(L):
            gates = (inp @ params["w_ih"][l].T + h[l] @ params["w_hh"][l].T
                     + params["b_ih"][l] + params["b_hh"][l])
            i_g = jax.nn.sigmoid(gates[:, 0 * H:1 * H])
            f_g = jax.nn.sigmoid(gates[:, 1 * H:2 * H])
            g_g = jnp.tanh(gates[:, 2 * H:3 * H])
            o_g = jax.nn.sigmoid(gates[:, 3 * H:4 * H])
            c[l] = f_g * c[l] + i_g * g_g
            h[l] = o_g * jnp.tanh(c[l])
            inp = h[l]
        preds.append(inp @ params["fc_w"].T + params["fc_b"])
    pred_all = jnp.stack(preds, axis=0)
    predictions = pred_all[0] if T == 1 else pred_all
    return predictions, jnp.stack(h, axis=0), jnp.stack(c, axis=0)


if __name__ == "__main__":
    # Small decoder config (p only affects training-mode dropout).
    input_size, hidden_size, output_size, num_layers, p = 16, 32, 16, 2, 0.1

    key = jax.random.PRNGKey(0)
    kp, k1, k2, k3, k4, k5, k6 = jax.random.split(key, 7)
    params = init_decoder_params(kp, input_size, hidden_size, output_size, num_layers)

    # --- Case 1: single autoregressive decode step (T=1 -> .squeeze(0)) ------
    T1, B1 = 1, 8
    x1 = jax.random.normal(k1, (T1, B1, input_size), jnp.float32)
    h1 = jax.random.normal(k2, (num_layers, B1, hidden_size), jnp.float32)
    c1 = jax.random.normal(k3, (num_layers, B1, hidden_size), jnp.float32)

    pred1, hout1, cout1 = decoder_forward(
        x1, h1, c1, params, input_size, hidden_size, output_size)
    jax.block_until_ready((pred1, hout1, cout1))

    pr1, hr1, cr1 = decoder_reference(x1, h1, c1, params)
    assert pred1.shape == (B1, output_size)
    assert hout1.shape == (num_layers, B1, hidden_size)
    assert cout1.shape == (num_layers, B1, hidden_size)
    # bf16 matmul operands -> moderate tolerance vs the f32 reference.
    assert jnp.max(jnp.abs(pred1 - pr1)) < 3e-2
    assert jnp.max(jnp.abs(hout1 - hr1)) < 3e-2
    assert jnp.max(jnp.abs(cout1 - cr1)) < 3e-2

    # --- Case 2: chunked decode (amortizes weight DMA / launch overhead) -----
    # T=16 exercises the lax.fori_loop time loop; batch=16 gives a 2-wide
    # "parallel" batch grid (both TensorCores on v7x).
    T2, B2 = 16, 16
    x2 = jax.random.normal(k4, (T2, B2, input_size), jnp.float32)
    h2 = jax.random.normal(k5, (num_layers, B2, hidden_size), jnp.float32)
    c2 = jax.random.normal(k6, (num_layers, B2, hidden_size), jnp.float32)

    pred2, hout2, cout2 = decoder_forward(
        x2, h2, c2, params, input_size, hidden_size, output_size)
    jax.block_until_ready((pred2, hout2, cout2))

    pr2, hr2, cr2 = decoder_reference(x2, h2, c2, params)
    assert pred2.shape == (T2, B2, output_size)
    assert hout2.shape == (num_layers, B2, hidden_size)
    assert jnp.max(jnp.abs(pred2 - pr2)) < 5e-2
    assert jnp.max(jnp.abs(hout2 - hr2)) < 5e-2
    assert jnp.max(jnp.abs(cout2 - cr2)) < 5e-2

    print("KERNEL_OK")
</pallas_src>

<mosaic_0001>
module attributes {stable_mosaic.version = 11 : i64} {
  func.func @kernel(%arg0: i32, %arg1: memref<1x8x16xf32, #tpu.memory_space<vmem>>, %arg2: memref<2x8x32xf32, #tpu.memory_space<vmem>>, %arg3: memref<2x8x32xf32, #tpu.memory_space<vmem>>, %arg4: memref<16x128xbf16, #tpu.memory_space<vmem>>, %arg5: memref<32x128xbf16, #tpu.memory_space<vmem>>, %arg6: memref<1x128xf32, #tpu.memory_space<vmem>>, %arg7: memref<32x128xbf16, #tpu.memory_space<vmem>>, %arg8: memref<32x128xbf16, #tpu.memory_space<vmem>>, %arg9: memref<1x128xf32, #tpu.memory_space<vmem>>, %arg10: memref<32x128xbf16, #tpu.memory_space<vmem>>, %arg11: memref<1x128xf32, #tpu.memory_space<vmem>>, %arg12: memref<1x8x128xf32, #tpu.memory_space<vmem>>, %arg13: memref<2x8x32xf32, #tpu.memory_space<vmem>>, %arg14: memref<2x8x32xf32, #tpu.memory_space<vmem>>) attributes {dimension_semantics = [#tpu.dimension_semantics<parallel>], iteration_bounds = array<i64: 1>, scalar_prefetch = 0 : i64, scratch_operands = 0 : i64, tpu.core_type = #tpu.core_type<tc>, window_params = [{transform_indices = @transform_0, window_bounds = array<i64: 1, 8, 16>}, {transform_indices = @transform_1, window_bounds = array<i64: 2, 8, 32>}, {transform_indices = @transform_2, window_bounds = array<i64: 2, 8, 32>}, {pipeline_mode = #tpu.pipeline_mode<synchronous>, transform_indices = @transform_3, window_bounds = array<i64: 16, 128>}, {pipeline_mode = #tpu.pipeline_mode<synchronous>, transform_indices = @transform_4, window_bounds = array<i64: 32, 128>}, {pipeline_mode = #tpu.pipeline_mode<synchronous>, transform_indices = @transform_5, window_bounds = array<i64: 1, 128>}, {pipeline_mode = #tpu.pipeline_mode<synchronous>, transform_indices = @transform_6, window_bounds = array<i64: 32, 128>}, {pipeline_mode = #tpu.pipeline_mode<synchronous>, transform_indices = @transform_7, window_bounds = array<i64: 32, 128>}, {pipeline_mode = #tpu.pipeline_mode<synchronous>, transform_indices = @transform_8, window_bounds = array<i64: 1, 128>}, {pipeline_mode = #tpu.pipeline_mode<synchronous>, transform_indices = @transform_9, window_bounds = array<i64: 32, 128>}, {pipeline_mode = #tpu.pipeline_mode<synchronous>, transform_indices = @transform_10, window_bounds = array<i64: 1, 128>}, {transform_indices = @transform_11, window_bounds = array<i64: 1, 8, 128>}, {transform_indices = @transform_12, window_bounds = array<i64: 2, 8, 32>}, {transform_indices = @transform_13, window_bounds = array<i64: 2, 8, 32>}]} {
    %c0 = arith.constant 0 : index
    %c0_0 = arith.constant 0 : index
    %0 = vector.load %arg4[%c0, %c0_0] : memref<16x128xbf16, #tpu.memory_space<vmem>>, vector<16x128xbf16>
    %c0_1 = arith.constant 0 : index
    %c0_2 = arith.constant 0 : index
    %1 = vector.load %arg7[%c0_1, %c0_2] : memref<32x128xbf16, #tpu.memory_space<vmem>>, vector<32x128xbf16>
    %c0_3 = arith.constant 0 : index
    %c0_4 = arith.constant 0 : index
    %2 = vector.load %arg5[%c0_3, %c0_4] : memref<32x128xbf16, #tpu.memory_space<vmem>>, vector<32x128xbf16>
    %c0_5 = arith.constant 0 : index
    %c0_6 = arith.constant 0 : index
    %3 = vector.load %arg8[%c0_5, %c0_6] : memref<32x128xbf16, #tpu.memory_space<vmem>>, vector<32x128xbf16>
    %c0_7 = arith.constant 0 : index
    %c0_8 = arith.constant 0 : index
    %4 = vector.load %arg6[%c0_7, %c0_8] : memref<1x128xf32, #tpu.memory_space<vmem>>, vector<1x128xf32>
    %c0_9 = arith.constant 0 : index
    %c0_10 = arith.constant 0 : index
    %5 = vector.load %arg9[%c0_9, %c0_10] : memref<1x128xf32, #tpu.memory_space<vmem>>, vector<1x128xf32>
    %c0_11 = arith.constant 0 : index
    %c0_12 = arith.constant 0 : index
    %6 = vector.load %arg10[%c0_11, %c0_12] : memref<32x128xbf16, #tpu.memory_space<vmem>>, vector<32x128xbf16>
    %c0_13 = arith.constant 0 : index
    %c0_14 = arith.constant 0 : index
    %7 = vector.load %arg11[%c0_13, %c0_14] : memref<1x128xf32, #tpu.memory_space<vmem>>, vector<1x128xf32>
    %c0_15 = arith.constant 0 : index
    %c0_16 = arith.constant 0 : index
    %c0_17 = arith.constant 0 : index
    %8 = vector.load %arg2[%c0_15, %c0_16, %c0_17] : memref<2x8x32xf32, #tpu.memory_space<vmem>>, vector<1x8x32xf32>
    %9 = vector.shape_cast %8 : vector<1x8x32xf32> to vector<8x32xf32>
    %c1 = arith.constant 1 : index
    %c0_18 = arith.constant 0 : index
    %c0_19 = arith.constant 0 : index
    %10 = vector.load %arg2[%c1, %c0_18, %c0_19] : memref<2x8x32xf32, #tpu.memory_space<vmem>>, vector<1x8x32xf32>
    %11 = vector.shape_cast %10 : vector<1x8x32xf32> to vector<8x32xf32>
    %c0_20 = arith.constant 0 : index
    %c0_21 = arith.constant 0 : index
    %c0_22 = arith.constant 0 : index
    %12 = vector.load %arg3[%c0_20, %c0_21, %c0_22] : memref<2x8x32xf32, #tpu.memory_space<vmem>>, vector<1x8x32xf32>
    %13 = vector.shape_cast %12 : vector<1x8x32xf32> to vector<8x32xf32>
    %c1_23 = arith.constant 1 : index
    %c0_24 = arith.constant 0 : index
    %c0_25 = arith.constant 0 : index
    %14 = vector.load %arg3[%c1_23, %c0_24, %c0_25] : memref<2x8x32xf32, #tpu.memory_space<vmem>>, vector<1x8x32xf32>
    %15 = vector.shape_cast %14 : vector<1x8x32xf32> to vector<8x32xf32>
    %c0_26 = arith.constant 0 : index
    %c0_27 = arith.constant 0 : index
    %c0_28 = arith.constant 0 : index
    %16 = vector.load %arg1[%c0_26, %c0_27, %c0_28] : memref<1x8x16xf32, #tpu.memory_space<vmem>>, vector<1x8x16xf32>
    %17 = vector.shape_cast %16 : vector<1x8x16xf32> to vector<8x16xf32>
    %18 = arith.truncf %17 : vector<8x16xf32> to vector<8x16xbf16>
    %cst = arith.constant dense<0.000000e+00> : vector<8x128xf32>
    %19 = tpu.matmul %18, %0, %cst {dimension_numbers = #tpu.dot_dimension_numbers<[1], [0], [0], [1], [0, 0, 1, 1], [], []>} : vector<8x16xbf16>, vector<16x128xbf16>, vector<8x128xf32> -> vector<8x128xf32>
    %20 = arith.truncf %9 : vector<8x32xf32> to vector<8x32xbf16>
    %cst_29 = arith.constant dense<0.000000e+00> : vector<8x128xf32>
    %21 = tpu.matmul %20, %2, %cst_29 {dimension_numbers = #tpu.dot_dimension_numbers<[1], [0], [0], [1], [0, 0, 1, 1], [], []>} : vector<8x32xbf16>, vector<32x128xbf16>, vector<8x128xf32> -> vector<8x128xf32>
    %22 = arith.addf %19, %21 : vector<8x128xf32>
    %23 = vector.broadcast %4 : vector<1x128xf32> to vector<8x128xf32>
    %24 = arith.addf %22, %23 : vector<8x128xf32>
    %25 = vector.extract_strided_slice %24 {offsets = [0, 0], sizes = [8, 96], strides = [1, 1]} : vector<8x128xf32> to vector<8x96xf32>
    %26 = arith.negf %25 : vector<8x96xf32>
    %27 = math.exp %26 : vector<8x96xf32>
    %cst_30 = arith.constant 1.000000e+00 : f32
    %28 = vector.broadcast %cst_30 : f32 to vector<8x96xf32>
    %29 = arith.addf %28, %27 : vector<8x96xf32>
    %30 = arith.divf %28, %29 : vector<8x96xf32>
    %31 = vector.extract_strided_slice %30 {offsets = [0, 0], sizes = [8, 32], strides = [1, 1]} : vector<8x96xf32> to vector<8x32xf32>
    %32 = vector.extract_strided_slice %30 {offsets = [0, 32], sizes = [8, 32], strides = [1, 1]} : vector<8x96xf32> to vector<8x32xf32>
    %33 = vector.extract_strided_slice %30 {offsets = [0, 64], sizes = [8, 32], strides = [1, 1]} : vector<8x96xf32> to vector<8x32xf32>
    %34 = vector.extract_strided_slice %24 {offsets = [0, 96], sizes = [8, 32], strides = [1, 1]} : vector<8x128xf32> to vector<8x32xf32>
    %35 = math.tanh %34 : vector<8x32xf32>
    %36 = arith.mulf %32, %13 : vector<8x32xf32>
    %37 = arith.mulf %31, %35 : vector<8x32xf32>
    %38 = arith.addf %36, %37 : vector<8x32xf32>
    %39 = math.tanh %38 : vector<8x32xf32>
    %40 = arith.mulf %33, %39 : vector<8x32xf32>
    %41 = arith.truncf %40 : vector<8x32xf32> to vector<8x32xbf16>
    %cst_31 = arith.constant dense<0.000000e+00> : vector<8x128xf32>
    %42 = tpu.matmul %41, %1, %cst_31 {dimension_numbers = #tpu.dot_dimension_numbers<[1], [0], [0], [1], [0, 0, 1, 1], [], []>} : vector<8x32xbf16>, vector<32x128xbf16>, vector<8x128xf32> -> vector<8x128xf32>
    %43 = arith.truncf %11 : vector<8x32xf32> to vector<8x32xbf16>
    %cst_32 = arith.constant dense<0.000000e+00> : vector<8x128xf32>
    %44 = tpu.matmul %43, %3, %cst_32 {dimension_numbers = #tpu.dot_dimension_numbers<[1], [0], [0], [1], [0, 0, 1, 1], [], []>} : vector<8x32xbf16>, vector<32x128xbf16>, vector<8x128xf32> -> vector<8x128xf32>
    %45 = arith.addf %42, %44 : vector<8x128xf32>
    %46 = vector.broadcast %5 : vector<1x128xf32> to vector<8x128xf32>
    %47 = arith.addf %45, %46 : vector<8x128xf32>
    %48 = vector.extract_strided_slice %47 {offsets = [0, 0], sizes = [8, 96], strides = [1, 1]} : vector<8x128xf32> to vector<8x96xf32>
    %49 = arith.negf %48 : vector<8x96xf32>
    %50 = math.exp %49 : vector<8x96xf32>
    %cst_33 = arith.constant 1.000000e+00 : f32
    %51 = vector.broadcast %cst_33 : f32 to vector<8x96xf32>
    %52 = arith.addf %51, %50 : vector<8x96xf32>
    %53 = arith.divf %51, %52 : vector<8x96xf32>
    %54 = vector.extract_strided_slice %53 {offsets = [0, 0], sizes = [8, 32], strides = [1, 1]} : vector<8x96xf32> to vector<8x32xf32>
    %55 = vector.extract_strided_slice %53 {offsets = [0, 32], sizes = [8, 32], strides = [1, 1]} : vector<8x96xf32> to vector<8x32xf32>
    %56 = vector.extract_strided_slice %53 {offsets = [0, 64], sizes = [8, 32], strides = [1, 1]} : vector<8x96xf32> to vector<8x32xf32>
    %57 = vector.extract_strided_slice %47 {offsets = [0, 96], sizes = [8, 32], strides = [1, 1]} : vector<8x128xf32> to vector<8x32xf32>
    %58 = math.tanh %57 : vector<8x32xf32>
    %59 = arith.mulf %55, %15 : vector<8x32xf32>
    %60 = arith.mulf %54, %58 : vector<8x32xf32>
    %61 = arith.addf %59, %60 : vector<8x32xf32>
    %62 = math.tanh %61 : vector<8x32xf32>
    %63 = arith.mulf %56, %62 : vector<8x32xf32>
    %64 = arith.truncf %63 : vector<8x32xf32> to vector<8x32xbf16>
    %cst_34 = arith.constant dense<0.000000e+00> : vector<8x128xf32>
    %65 = tpu.matmul %64, %6, %cst_34 {dimension_numbers = #tpu.dot_dimension_numbers<[1], [0], [0], [1], [0, 0, 1, 1], [], []>} : vector<8x32xbf16>, vector<32x128xbf16>, vector<8x128xf32> -> vector<8x128xf32>
    %66 = vector.broadcast %7 : vector<1x128xf32> to vector<8x128xf32>
    %67 = arith.addf %65, %66 : vector<8x128xf32>
    %c0_35 = arith.constant 0 : index
    %c0_36 = arith.constant 0 : index
    %c0_37 = arith.constant 0 : index
    %68 = vector.load %arg12[%c0_35, %c0_36, %c0_37] : memref<1x8x128xf32, #tpu.memory_space<vmem>>, vector<1x8x128xf32>
    %69 = vector.shape_cast %68 : vector<1x8x128xf32> to vector<8x128xf32>
    %70 = vector.shape_cast %67 : vector<8x128xf32> to vector<1x8x128xf32>
    tpu.vector_store %arg12[%c0_35, %c0_36, %c0_37], %70 {strides = array<i32>} : memref<1x8x128xf32, #tpu.memory_space<vmem>>, vector<1x8x128xf32>,
    %c0_38 = arith.constant 0 : index
    %c0_39 = arith.constant 0 : index
    %c0_40 = arith.constant 0 : index
    %71 = vector.load %arg13[%c0_38, %c0_39, %c0_40] : memref<2x8x32xf32, #tpu.memory_space<vmem>>, vector<1x8x32xf32>
    %72 = vector.shape_cast %71 : vector<1x8x32xf32> to vector<8x32xf32>
    %73 = vector.shape_cast %40 : vector<8x32xf32> to vector<1x8x32xf32>
    tpu.vector_store %arg13[%c0_38, %c0_39, %c0_40], %73 {strides = array<i32>} : memref<2x8x32xf32, #tpu.memory_space<vmem>>, vector<1x8x32xf32>,
    %c0_41 = arith.constant 0 : index
    %c0_42 = arith.constant 0 : index
    %c0_43 = arith.constant 0 : index
    %74 = vector.load %arg14[%c0_41, %c0_42, %c0_43] : memref<2x8x32xf32, #tpu.memory_space<vmem>>, vector<1x8x32xf32>
    %75 = vector.shape_cast %74 : vector<1x8x32xf32> to vector<8x32xf32>
    %76 = vector.shape_cast %38 : vector<8x32xf32> to vector<1x8x32xf32>
    tpu.vector_store %arg14[%c0_41, %c0_42, %c0_43], %76 {strides = array<i32>} : memref<2x8x32xf32, #tpu.memory_space<vmem>>, vector<1x8x32xf32>,
    %c1_44 = arith.constant 1 : index
    %c0_45 = arith.constant 0 : index
    %c0_46 = arith.constant 0 : index
    %77 = vector.load %arg13[%c1_44, %c0_45, %c0_46] : memref<2x8x32xf32, #tpu.memory_space<vmem>>, vector<1x8x32xf32>
    %78 = vector.shape_cast %77 : vector<1x8x32xf32> to vector<8x32xf32>
    %79 = vector.shape_cast %63 : vector<8x32xf32> to vector<1x8x32xf32>
    tpu.vector_store %arg13[%c1_44, %c0_45, %c0_46], %79 {strides = array<i32>} : memref<2x8x32xf32, #tpu.memory_space<vmem>>, vector<1x8x32xf32>,
    %c1_47 = arith.constant 1 : index
    %c0_48 = arith.constant 0 : index
    %c0_49 = arith.constant 0 : index
    %80 = vector.load %arg14[%c1_47, %c0_48, %c0_49] : memref<2x8x32xf32, #tpu.memory_space<vmem>>, vector<1x8x32xf32>
    %81 = vector.shape_cast %80 : vector<1x8x32xf32> to vector<8x32xf32>
    %82 = vector.shape_cast %61 : vector<8x32xf32> to vector<1x8x32xf32>
    tpu.vector_store %arg14[%c1_47, %c0_48, %c0_49], %82 {strides = array<i32>} : memref<2x8x32xf32, #tpu.memory_space<vmem>>, vector<1x8x32xf32>,
    return
  }
  func.func @transform_0(%arg0: i32) -> (i32, i32, i32) {
    %c0_i32 = arith.constant 0 : i32
    %c0_i32_0 = arith.constant 0 : i32
    %c0_i32_1 = arith.constant 0 : i32
    return %c0_i32, %arg0, %c0_i32_0 : i32, i32, i32
  }
  func.func @transform_1(%arg0: i32) -> (i32, i32, i32) {
    %c0_i32 = arith.constant 0 : i32
    %c0_i32_0 = arith.constant 0 : i32
    %c0_i32_1 = arith.constant 0 : i32
    return %c0_i32, %arg0, %c0_i32_0 : i32, i32, i32
  }
  func.func @transform_2(%arg0: i32) -> (i32, i32, i32) {
    %c0_i32 = arith.constant 0 : i32
    %c0_i32_0 = arith.constant 0 : i32
    %c0_i32_1 = arith.constant 0 : i32
    return %c0_i32, %arg0, %c0_i32_0 : i32, i32, i32
  }
  func.func @transform_3(%arg0: i32) -> (i32, i32) {
    %c0_i32 = arith.constant 0 : i32
    %c0_i32_0 = arith.constant 0 : i32
    %c0_i32_1 = arith.constant 0 : i32
    return %c0_i32, %c0_i32_0 : i32, i32
  }
  func.func @transform_4(%arg0: i32) -> (i32, i32) {
    %c0_i32 = arith.constant 0 : i32
    %c0_i32_0 = arith.constant 0 : i32
    %c0_i32_1 = arith.constant 0 : i32
    return %c0_i32, %c0_i32_0 : i32, i32
  }
  func.func @transform_5(%arg0: i32) -> (i32, i32) {
    %c0_i32 = arith.constant 0 : i32
    %c0_i32_0 = arith.constant 0 : i32
    %c0_i32_1 = arith.constant 0 : i32
    return %c0_i32, %c0_i32_0 : i32, i32
  }
  func.func @transform_6(%arg0: i32) -> (i32, i32) {
    %c0_i32 = arith.constant 0 : i32
    %c0_i32_0 = arith.constant 0 : i32
    %c0_i32_1 = arith.constant 0 : i32
    return %c0_i32, %c0_i32_0 : i32, i32
  }
  func.func @transform_7(%arg0: i32) -> (i32, i32) {
    %c0_i32 = arith.constant 0 : i32
    %c0_i32_0 = arith.constant 0 : i32
    %c0_i32_1 = arith.constant 0 : i32
    return %c0_i32, %c0_i32_0 : i32, i32
  }
  func.func @transform_8(%arg0: i32) -> (i32, i32) {
    %c0_i32 = arith.constant 0 : i32
    %c0_i32_0 = arith.constant 0 : i32
    %c0_i32_1 = arith.constant 0 : i32
    return %c0_i32, %c0_i32_0 : i32, i32
  }
  func.func @transform_9(%arg0: i32) -> (i32, i32) {
    %c0_i32 = arith.constant 0 : i32
    %c0_i32_0 = arith.constant 0 : i32
    %c0_i32_1 = arith.constant 0 : i32
    return %c0_i32, %c0_i32_0 : i32, i32
  }
  func.func @transform_10(%arg0: i32) -> (i32, i32) {
    %c0_i32 = arith.constant 0 : i32
    %c0_i32_0 = arith.constant 0 : i32
    %c0_i32_1 = arith.constant 0 : i32
    return %c0_i32, %c0_i32_0 : i32, i32
  }
  func.func @transform_11(%arg0: i32) -> (i32, i32, i32) {
    %c0_i32 = arith.constant 0 : i32
    %c0_i32_0 = arith.constant 0 : i32
    %c0_i32_1 = arith.constant 0 : i32
    return %c0_i32, %arg0, %c0_i32_0 : i32, i32, i32
  }
  func.func @transform_12(%arg0: i32) -> (i32, i32, i32) {
    %c0_i32 = arith.constant 0 : i32
    %c0_i32_0 = arith.constant 0 : i32
    %c0_i32_1 = arith.constant 0 : i32
    return %c0_i32, %arg0, %c0_i32_0 : i32, i32, i32
  }
  func.func @transform_13(%arg0: i32) -> (i32, i32, i32) {
    %c0_i32 = arith.constant 0 : i32
    %c0_i32_0 = arith.constant 0 : i32
    %c0_i32_1 = arith.constant 0 : i32
    return %c0_i32, %arg0, %c0_i32_0 : i32, i32, i32
  }
}

</mosaic_0001>

<bundles_post_ra>
// kernel: tpu_custom_call.1
= control target key start
LH: loop header
LB: loop body
LE: loop exit
PB: predicated region body
PF: predicated region fallthrough
CT: control target
= control target key end

     0   :  { %19 = vsyncpa [#allocation3], 0  ;;  %s1009_s0 = inlined_call_operand.vmem [shape: f32[1,8,16], index: 0, kind: input, shape index: {}]   ;;  %s1010_s1 = inlined_call_operand.hbm [shape: f32[2,8,32], index: 1, kind: input, shape index: {}, may-alias: {1,12}]   ;;  %s1011_s2 = inlined_call_operand.hbm [shape: f32[2,8,32], index: 2, kind: input, shape index: {}, may-alias: {2,13}]   ;;  %s1012_s3 = inlined_call_operand.hbm [shape: bf16[16,128], index: 3, kind: input, shape index: {}]   ;;  %s1013_s4 = inlined_call_operand.vmem [shape: bf16[32,128], index: 4, kind: input, shape index: {}]   ;;  %s1014_s5 = inlined_call_operand.hbm [shape: f32[1,128], index: 5, kind: input, shape index: {}]   ;;  %s1015_s6 = inlined_call_operand.vmem [shape: bf16[32,128], index: 6, kind: input, shape index: {}]   ;;  %s1016_s7 = inlined_call_operand.vmem [shape: bf16[32,128], index: 7, kind: input, shape index: {}]   ;;  %s1017_s8 = inlined_call_operand.hbm [shape: f32[1,128], index: 8, kind: input, shape index: {}]   ;;  %s1018_s9 = inlined_call_operand.hbm [shape: bf16[32,128], index: 9, kind: input, shape index: {}]   ;;  %s1019_s10 = inlined_call_operand.hbm [shape: f32[1,128], index: 10, kind: input, shape index: {}]   ;;  %s1020_s11 = inlined_call_operand.hbm [shape: f32[1,8,128], index: 11, kind: output, shape index: {0}]   ;;  %s1021_s12 = inlined_call_operand.hbm [shape: f32[2,8,32], index: 12, kind: output, shape index: {1}, may-alias: {1,12}]   ;;  %s1022_s13 = inlined_call_operand.hbm [shape: f32[2,8,32], index: 13, kind: output, shape index: {2}, may-alias: {2,13}]  }
   0x1   :  { %20 = vsyncpa [#allocation6], 0 }
   0x2   :  { %21 = vsyncpa [#allocation9], 0 }
   0x3   :  { %22 = vsyncpa [#allocation12], 0 }
   0x4   :  { %23 = vsyncpa [#allocation4], 0 }
   0x5   :  { %24 = vsyncpa [#allocation16], 0  ;;  %s44_s27 = sshll.u32 %s1011_s2, 4  ;;  %s832_s28 = smov [#allocation5]   ;;  %s45_s27 = int_to_ptr.hbm [resolvable:$true] %s44_s27 }
   0x6   :  { %s46_s29 = sshll.u32 %s832_s28, 4  ;;  %s73_s15 = sshll.u32 %s1014_s5, 4  ;;  %s47_s29 = int_to_ptr.vmem [resolvable:$true] %s46_s29  ;;  %s74_s15 = int_to_ptr.hbm [resolvable:$true] %s73_s15 }
   0x7   :  { %s833_s16 = smov 128   ;;  %s834_s17 = smov 8  }
   0x8   :  { %52 = dma.hbm_to_vmem [thread:$0]  %s45_s27, 256, %s47_s29, [#allocation6], %s833_s16, %s833_s16, %s834_s17  }
   0x9   :  { %s835_s18 = smov [#allocation8]   ;;  %s98_s21 = sshll.u32 %s1018_s9, 4  ;;  %s99_s21 = int_to_ptr.hbm [resolvable:$true] %s98_s21 }
   0xa   :  { %s75_s19 = sshll.u32 %s835_s18, 4  ;;  %s836_s22 = smov [#allocation11]   ;;  %s76_s19 = int_to_ptr.vmem [resolvable:$true] %s75_s19 }
   0xb   :  { %78 = dma.hbm_to_vmem [thread:$0]  %s74_s15, 16, %s76_s19, [#allocation9]  }
   0xc   :  { %s100_s23 = sshll.u32 %s836_s22, 4  ;;  %s31_s25 = sshll.u32 %s1010_s1, 4  ;;  %s101_s23 = int_to_ptr.vmem [resolvable:$true] %s100_s23  ;;  %s32_s25 = int_to_ptr.hbm [resolvable:$true] %s31_s25 }
   0xd   :  { %s837_s26 = smov 64   ;;  %s838_s28 = smov 4  }
   0xe   :  { %106 = dma.hbm_to_vmem [thread:$0]  %s99_s21, 256, %s101_s23, [#allocation12], %s837_s26, %s837_s26, %s838_s28  }
   0xf   :  { %s839_s27 = smov [#allocation2]   ;;  %s57_s9 = sshll.u32 %s1012_s3, 4  ;;  %s58_s9 = int_to_ptr.hbm [resolvable:$true] %s57_s9 }
  0x10   :  { %s33_s29 = sshll.u32 %s839_s27, 4  ;;  %s88_s18 = sshll.u32 %s1017_s8, 4  ;;  %s34_s29 = int_to_ptr.vmem [resolvable:$true] %s33_s29  ;;  %s89_s18 = int_to_ptr.hbm [resolvable:$true] %s88_s18 }
  0x11   :  { %39 = dma.hbm_to_vmem [thread:$0]  %s32_s25, 256, %s34_s29, [#allocation3], %s833_s16, %s833_s16, %s834_s17  }
  0x12   :  { %s840_s19 = smov [#allocation7]   ;;  %s841_s20 = smov [#allocation10]  }
  0x13   :  { %s59_s2 = sshll.u32 %s840_s19, 4  ;;  %s90_s21 = sshll.u32 %s841_s20, 4  ;;  %s60_s2 = int_to_ptr.vmem [resolvable:$true] %s59_s2  ;;  %s91_s21 = int_to_ptr.vmem [resolvable:$true] %s90_s21 }
  0x14   :  { %65 = dma.hbm_to_vmem [thread:$0]  %s58_s9, 128, %s60_s2, [#allocation6], %s837_s26, %s837_s26, %s838_s28  }
  0x15   :  { %s112_s23 = sshll.u32 %s1019_s10, 4  ;;  %s842_s5 = smov [#allocation13]   ;;  %s113_s23 = int_to_ptr.hbm [resolvable:$true] %s112_s23 }
  0x16   :  { %93 = dma.hbm_to_vmem [thread:$0]  %s89_s18, 16, %s91_s21, [#allocation9]  }
  0x17   :  { %s114_s24 = sshll.u32 %s842_s5, 4  ;;  %s115_s24 = int_to_ptr.vmem [resolvable:$true] %s114_s24 }
  0x18   :  { %117 = dma.hbm_to_vmem [thread:$0]  %s113_s23, 16, %s115_s24, [#allocation12]  }
  0x19   :  { %820 = dma.done.wait [#allocation3], 256  }
  0x1a   :  { %821 = vsyncadd [#allocation3], 4294967040 }
  0x1b   :  { %822 = dma.done.wait [#allocation6], 384  }
  0x1c   :  { %823 = vsyncadd [#allocation6], 4294966912 }
  0x1d   :  { %824 = dma.done.wait [#allocation9], 32  }
  0x1e   :  { %825 = vsyncadd [#allocation9], 4294967264 }
  0x1f   :  { %826 = dma.done.wait [#allocation12], 272  }
  0x20   :  { %827 = vsyncadd [#allocation12], 4294967024  ;;  %v540_v0 = vld [vmem:[%s1013_s4 + $0x8] sm:$0xff]  ;;  %v536_v1 = vld [vmem:[#allocation7] sm:$0xff]  ;;  %vm212_vm0 = vcmask 130048   ;;  %vm189_vm1 = vcmask 261120  }
  0x21   :  { %v174_v2 = vld [vmem:[%s1009_s0] sm:$0xff]  ;;  %199 = vmatpush.bf16.msra.mxu0 %v540_v0  ;;  %223 = vmatpush.bf16.msra.mxu1 %v536_v1  ;;  %v561_v8 = vld [vmem:[#allocation8] ss:$0 sm:$0xff]  ;;  %s843_s0 = smov 32   ;;  %v171_v15 = vld [vmem:[#allocation5] sm:$0xff]  ;;  %s455_s20 = sshll.u32 %s1021_s12, 4  ;;  %s456_s20 = int_to_ptr.hbm [resolvable:$true] %s455_s20 }
  0x22   :  { %v175_v3 = vpack.c.bf16 %v174_v2, %v174_v2  ;;  %v539_v4 = vld [vmem:[%s1013_s4] sm:$0xff]  ;;  %v542_v36 = vld [vmem:[%s1016_s7 + $0x8] sm:$0xff]  ;;  %v173_v45 = vld [vmem:[#allocation5 + $0x8] sm:$0xff]  ;;  %s468_s23 = sshll.u32 %s1022_s13, 4  ;;  %s846_s5 = smov [#allocation17]   ;;  %s469_s23 = int_to_ptr.hbm [resolvable:$true] %s468_s23 }
  0x23   :  { %v168_v5 = vld [vmem:[#allocation2] sm:$0xff]  ;;  %v538_v37 = vld [vmem:[%s1015_s6 + $0x8] sm:$0xff]  ;;  %297 = vmatpush.bf16.msra.mxu2 %v542_v36  ;;  %s466_s24 = sshll.u32 %s846_s5, 4  ;;  %s847_s12 = smov [#allocation14]   ;;  %s467_s24 = int_to_ptr.vmem [resolvable:$true] %s466_s24 }
  0x24   :  { %506 = vmatmul.msk.bf16.vlgmr.msra.gmra.mxu1 %vm212_vm0, %v175_v3  ;;  %v176_v6 = vpack.c.bf16 %v168_v5, %v168_v5  ;;  %v541_v38 = vld [vmem:[%s1016_s7] sm:$0xff]  ;;  %v170_v39 = vld [vmem:[#allocation2 + $0x8] sm:$0xff]  ;;  %328 = vmatpush.bf16.msra.mxu3 %v538_v37  ;;  %s443_s8 = sshll.u32 %s847_s12, 4  ;;  %s445_s28 = sshll.u32 %s1020_s11, 4  ;;  %s444_s8 = int_to_ptr.vmem [resolvable:$true] %s443_s8  ;;  %s446_s28 = int_to_ptr.hbm [resolvable:$true] %s445_s28 }
  0x25   :  { %200 = vmatpush.bf16.msra.mxu0 %v539_v4  ;;  %v537_v40 = vld [vmem:[%s1015_s6] sm:$0xff]  ;;  %v275_v41 = vpack.c.bf16 %v170_v39, %v170_v39  ;;  %v562_v49 = vld [vmem:[#allocation10] ss:$0 sm:$0xff]  ;;  %s844_s6 = smov 96  }
  0x27   :  { %298 = vmatpush.bf16.msra.mxu2 %v541_v38 }
  0x28   :  { %501 = vmatmul.msk.bf16.vlgmr.msra.gmra.mxu0 %vm189_vm1, %v176_v6  ;;  %329 = vmatpush.bf16.msra.mxu3 %v537_v40 }
  0x2a   :  { %516 = vmatmul.msk.bf16.vlgmr.msra.gmra.mxu2 %vm189_vm1, %v275_v41 }
  0xa1   :  { %v225_v7 = vpop.f32.mrf.mxu1 }
  0xa5   :  { %v202_v9 = vpop.f32.mrf.mxu0 }
  0xa6   :  { %v226_v10 = vadd.f32 %v225_v7, %v202_v9 }
  0xa8   :  { %v232_v11 = vadd.f32 %v561_v8, %v226_v10 }
  0xa9   :  { %v227_v12 = vpop.f32.mrf.mxu1 }
  0xaa   :  { %564 = vtanh.f32 %v232_v11  ;;  %v507_v16 = vmul.f32 -1.442695, %v232_v11 }
  0xac   :  { %566 = vpow2.f32 %v507_v16  ;;  %v544_v16 = vld [vmem:[#allocation11 + $0x8] sm:$0xff] }
  0xad   :  { %v204_v13 = vpop.f32.mrf.mxu0  ;;  %v300_v47 = vpop.f32.mrf.mxu2  ;;  %408 = vmatpush.bf16.msrb.mxu1 %v544_v16 }
  0xb0   :  { %v565_v14 = vpop.eup %564 }
  0xb1   :  { %259 = vrot.lane.b32.xlu0 %v565_v14, %s843_s0 }
  0xb2   :  { %v567_v17 = vpop.eup %566 }
  0xb3   :  { %v236_v18 = vadd.f32 1.0, %v567_v17  ;;  %v543_v17 = vld [vmem:[#allocation11] sm:$0xff] }
  0xb4   :  { %409 = vmatpush.bf16.msrb.mxu1 %v543_v17 }
  0xb5   :  { %568 = vrcp.f32 %v236_v18  ;;  %v248_v24 = vand.u32 2147483648, %v236_v18  ;;  %vm242_vm3 = vweird.f32 %v236_v18  ;;  %v246_v25 = vand.u32 2147483647, %v236_v18  ;;  %v302_v48 = vpop.f32.mrf.mxu2 }
  0xb7   :  { %v249_v27 = vor.u32 1.1754944e-38, %v248_v24  ;;  %vm247_vm5 = vcmp.eq.f32.partialorder %v246_v25, 8.507059e+37 }
  0xb9   :  { %254 = vrot.lane.b32.xlu0 %v171_v15, %s843_s0 }
  0xbb   :  { %v569_v19 = vpop.eup %568 }
  0xbc   :  { %v238_v20 = vmul.f32 %v569_v19, %v236_v18  ;;  %vm243_vm2 = vweird.f32 %v569_v19 }
  0xbd   :  { %vm244_vm4 = vmor %vm242_vm3, %vm243_vm2 }
  0xbe   :  { %v239_v21 = vsub.f32 1.0, %v238_v20 }
  0xc0   :  { %v240_v22 = vmul.f32 %v569_v19, %v239_v21  ;;  %v563_v21 = vld [vmem:[#allocation13] ss:$0 sm:$0xff] }
  0xc1   :  { %360 = vrot.lane.b32.xlu0 %v173_v45, %s843_s0 }
  0xc2   :  { %v241_v23 = vadd.f32 %v569_v19, %v240_v22 }
  0xc4   :  { %v245_v26 = vsel %vm244_vm4, %v569_v19, %v241_v23 }
  0xc5   :  { %v250_v29 = vsel %vm247_vm5, %v249_v27, %v245_v26 }
 0x123   :  { %v260_v28 = vpop.permute.xlu0 %259 }
 0x124   :  { %v262_v30 = vmul.f32 %v260_v28, %v250_v29 }
 0x126   :  { %264 = vrot.lane.b32.xlu1 %v262_v30, %s843_s0 }
 0x12b   :  { %v255_v31 = vpop.permute.xlu0 %254 }
 0x12c   :  { %v257_v32 = vmul.f32 %v255_v31, %v250_v29 }
 0x133   :  { %v361_v6 = vpop.permute.xlu0 %360 }
 0x198   :  { %v265_v33 = vpop.permute.xlu1 %264 }
 0x199   :  { %v962_v34 = vadd.f32 %v265_v33, %v257_v32 }
 0x19b   :  { %570 = vtanh.f32 %v962_v34 }
 0x1a1   :  { %v571_v35 = vpop.eup %570 }
 0x1a2   :  { %270 = vrot.lane.b32.xlu1 %v571_v35, %s843_s0 }
 0x214   :  { %v271_v42 = vpop.permute.xlu1 %270 }
 0x215   :  { %v273_v43 = vmul.f32 %v271_v42, %v250_v29 }
 0x217   :  { %v274_v44 = vpack.c.bf16 %v273_v43, %v273_v43 }
 0x219   :  { %305 = vrot.lane.b32.xlu2 %v274_v44, %s837_s26 }
 0x273   :  { %v306_v46 = vpop.permute.xlu2 %305 }
 0x274   :  { %525 = vmatmul.msk.bf16.vlgmr.msra.gmra.mxu3 %vm189_vm1, %v306_v46 }
 0x2f7   :  { %v331_v50 = vpop.f32.mrf.mxu3 }
 0x2f8   :  { %v332_v51 = vadd.f32 %v331_v50, %v300_v47 }
 0x2fa   :  { %v338_v52 = vadd.f32 %v562_v49, %v332_v51 }
 0x2fc   :  { %572 = vtanh.f32 %v338_v52  ;;  %v526_v55 = vmul.f32 -1.442695, %v338_v52 }
 0x2fe   :  { %574 = vpow2.f32 %v526_v55 }
 0x2ff   :  { %v333_v53 = vpop.f32.mrf.mxu3 }
 0x302   :  { %v573_v54 = vpop.eup %572 }
 0x303   :  { %365 = vrot.lane.b32.xlu2 %v573_v54, %s843_s0 }
 0x304   :  { %v575_v56 = vpop.eup %574 }
 0x305   :  { %v342_v57 = vadd.f32 1.0, %v575_v56 }
 0x307   :  { %576 = vrcp.f32 %v342_v57  ;;  %v354_v63 = vand.u32 2147483648, %v342_v57  ;;  %vm348_vm7 = vweird.f32 %v342_v57  ;;  %v352_v0 = vand.u32 2147483647, %v342_v57 }
 0x309   :  { %v355_v2 = vor.u32 1.1754944e-38, %v354_v63  ;;  %vm353_vm9 = vcmp.eq.f32.partialorder %v352_v0, 8.507059e+37 }
 0x30d   :  { %v577_v58 = vpop.eup %576 }
 0x30e   :  { %v344_v59 = vmul.f32 %v577_v58, %v342_v57  ;;  %vm349_vm6 = vweird.f32 %v577_v58 }
 0x30f   :  { %vm350_vm8 = vmor %vm348_vm7, %vm349_vm6 }
 0x310   :  { %v345_v60 = vsub.f32 1.0, %v344_v59 }
 0x312   :  { %v346_v61 = vmul.f32 %v577_v58, %v345_v60 }
 0x314   :  { %v347_v62 = vadd.f32 %v577_v58, %v346_v61 }
 0x316   :  { %v351_v1 = vsel %vm350_vm8, %v577_v58, %v347_v62 }
 0x317   :  { %v356_v3 = vsel %vm353_vm9, %v355_v2, %v351_v1 }
 0x318   :  { %v363_v7 = vmul.f32 %v361_v6, %v356_v3 }
 0x35d   :  { %v366_v4 = vpop.permute.xlu2 %365 }
 0x35e   :  { %v368_v5 = vmul.f32 %v366_v4, %v356_v3 }
 0x360   :  { %370 = vrot.lane.b32.xlu1 %v368_v5, %s843_s0 }
 0x368   :  { %417 = vrot.lane.b32.xlu1 %v273_v43, %s837_s26 }
 0x3d2   :  { %v371_v8 = vpop.permute.xlu1 %370 }
 0x3d3   :  { %v373_v9 = vadd.f32 %v371_v8, %v363_v7 }
 0x3d5   :  { %578 = vtanh.f32 %v373_v9  ;;  %433 = vrot.lane.b32.xlu1 %v373_v9, %s844_s6 }
 0x3da   :  { %v418_v10 = vpop.permute.xlu1 %417 }
 0x3db   :  { %v579_v11 = vpop.eup %578  ;;  %420 = vst.msk [vmem:[#allocation15] sm:$0xff] %vm189_vm1, %v418_v10 }
 0x3dc   :  { %376 = vrot.lane.b32.xlu2 %v579_v11, %s843_s0 }
 0x436   :  { %v377_v12 = vpop.permute.xlu2 %376 }
 0x437   :  { %v379_v13 = vmul.f32 %v377_v12, %v356_v3 }
 0x439   :  { %427 = vrot.lane.b32.xlu2 %v379_v13, %s837_s26  ;;  %v380_v14 = vpack.c.bf16 %v379_v13, %v379_v13 }
 0x43b   :  { %385 = vrot.lane.b32.xlu0 %v380_v14, %s837_s26  ;;  %s845_s26 = smov [#allocation15]  }
 0x43c   :  { %s453_s21 = sshll.u32 %s845_s26, 4  ;;  %s454_s21 = int_to_ptr.vmem [resolvable:$true] %s453_s21 }
 0x443   :  { %422 = vrot.lane.b32.xlu0 %v962_v34, %s844_s6 }
 0x447   :  { %v434_v15 = vpop.permute.xlu1 %433 }
 0x448   :  { %437 = vst.msk [vmem:[#allocation17 + $0x8] sm:$0xff] %vm189_vm1, %v434_v15 }
 0x493   :  { %v428_v18 = vpop.permute.xlu2 %427 }
 0x494   :  { %431 = vst.msk [vmem:[#allocation15 + $0x8] sm:$0xff] %vm189_vm1, %v428_v18 }
 0x495   :  { %461 = dma.vmem_to_hbm [thread:$0]  %s454_s21, 256, %s456_s20, [#allocation16], %s833_s16, %s833_s16, %s834_s17  }
 0x4ad   :  { %v386_v19 = vpop.permute.xlu0 %385 }
 0x4ae   :  { %535 = vmatmul.msk.bf16.vlgmr.msrb.gmra.mxu1 %vm189_vm1, %v386_v19 }
 0x4b5   :  { %v423_v20 = vpop.permute.xlu0 %422 }
 0x4b6   :  { %425 = vst.msk [vmem:[#allocation17] sm:$0xff] %vm189_vm1, %v423_v20 }
 0x4b7   :  { %474 = dma.vmem_to_hbm [thread:$0]  %s467_s24, 256, %s469_s23, [#allocation16], %s833_s16, %s833_s16, %s834_s17  }
 0x52b   :  { %v411_v22 = vpop.f32.mrf.mxu1 }
 0x52c   :  { %v412_v23 = vadd.f32 %v563_v21, %v411_v22 }
 0x52e   :  { %415 = vst [vmem:[#allocation14] sm:$0xff] %v412_v23 }
 0x52f   :  { %448 = dma.vmem_to_hbm [thread:$0]  %s444_s8, 128, %s446_s28, [#allocation4]  }
 0x533   :  { %v413_v24 = vpop.f32.mrf.mxu1 }
 0x534   :  { %828 = dma.done.wait [#allocation4], 128  }
 0x535   :  { %829 = vsyncadd [#allocation4], 4294967168 }
 0x536   :  { %830 = dma.done.wait [#allocation16], 512  }
 0x537   :  { %831 = vsyncadd [#allocation16], 4294966784 }
 0x538   :  { %487 = vsyncpa [#allocation3], 1 }
 0x539   :  { %488 = vsyncpa [#allocation6], 1 }
 0x53a   :  { %489 = vsyncpa [#allocation9], 1 }
 0x53b   :  { %490 = vsyncpa [#allocation12], 1 }
 0x53c   :  { %491 = vsyncpa [#allocation4], 1 }
 0x53d   :  { %492 = vsyncpa [#allocation16], 1 }

</bundles_post_ra>
